<compile_context>
chip_gen: v6e
topology: v6e:2x2x1
jax: 0.10.0
libtpu: 0.0.40
codegen_flags: <defaults>
</compile_context>

<pallas_src>
import jax
import jax.numpy as jnp
from jax import lax
from jax.experimental import pallas as pl
from jax.experimental.pallas import tpu as pltpu


def _kinlstm_kernel(x_ref, wih_ref, whh_ref, b_ref, wfc_ref, bfc_ref, out_ref):
    """Single-layer LSTM over the full sequence + final linear, one invocation.

    x_ref  : (T*B, I)  time-major, flattened input rows (row = t*B + b), f32
    wih_ref: (I, 4H)   input->gates weight, f32, gate order (i, f, o, g)
    whh_ref: (H, 4H)   hidden->gates weight, f32, gate order (i, f, o, g)
    b_ref  : (1, 4H)   bias_ih + bias_hh, f32, gate order (i, f, o, g)
    wfc_ref: (H, 3)    final linear weight (transposed), f32
    bfc_ref: (1, 3)    final linear bias, f32
    out_ref: (B, 3)    output
    """
    TB = x_ref.shape[0]
    H = whh_ref.shape[0]
    B = out_ref.shape[0]
    T = TB // B

    # ---- Phase 1: ONE fused input projection for all timesteps (single MXU
    # issue), kept vreg-resident. Off the serial chain entirely. ----
    xw = jnp.dot(x_ref[...], wih_ref[...],
                 preferred_element_type=jnp.float32) + b_ref[...]   # (T*B, 4H)

    # ---- Phase 2: serial recurrence. h/c are loop-carried values; W_hh is
    # loaded once so the MXU RHS stays stationary across steps. Full f32. ----
    whh = whh_ref[...]
    h = jnp.zeros((B, H), jnp.float32)
    c = jnp.zeros((B, H), jnp.float32)

    # Static Python loop: T is small and static here (bounded full unroll).
    # TODO(synk): for T beyond ~32 use fori_loop(unroll=4..8) + VMEM scratch.
    for t in range(T):
        gates = xw[t * B:(t + 1) * B, :] + jnp.dot(
            h, whh, preferred_element_type=jnp.float32)
        # Gate order (i, f, o, g): one sigmoid over the first 3H lanes, one
        # tanh over the last H lanes (2 EUP issues / step). The i/f/o lane
        # sub-slices are sub-vreg windows; acceptable under MXU latency here.
        sig = jax.nn.sigmoid(gates[:, :3 * H])
        g = jnp.tanh(gates[:, 3 * H:])
        i = sig[:, 0 * H:1 * H]
        f = sig[:, 1 * H:2 * H]
        o = sig[:, 2 * H:3 * H]
        c = f * c + i * g
        h = o * jnp.tanh(c)

    # ---- Final linear: (B, H) @ (H, 3) + (1, 3). ----
    out_ref[...] = (jnp.dot(h, wfc_ref[...],
                            preferred_element_type=jnp.float32) + bfc_ref[...])


def kinlstm_forward(x, kernel_params):
    """x: (B, T, 3) float32 (batch_first).  Returns (B, 3) float32."""
    B, T, I = x.shape
    w_ih_t, w_hh_t, b, w_fc_t, b_fc = kernel_params

    # Time-major then flatten: row index t*B + b.  Plain-XLA layout prep.
    x2d = jnp.transpose(x, (1, 0, 2)).reshape(T * B, I)

    return pl.pallas_call(
        _kinlstm_kernel,
        out_shape=jax.ShapeDtypeStruct((B, 3), jnp.float32),
        in_specs=[pl.BlockSpec(memory_space=pltpu.MemorySpace.VMEM)] * 6,
        out_specs=pl.BlockSpec(memory_space=pltpu.MemorySpace.VMEM),
    )(x2d, w_ih_t, w_hh_t, b, w_fc_t, b_fc)


def init_raw_params(key, hidden=32, input_size=3, out_size=3):
    """Raw parameters with the exact PyTorch nn.LSTM / nn.Linear shapes.

    weight_ih_l0 (4H, I), weight_hh_l0 (4H, H), bias_ih_l0 (4H,),
    bias_hh_l0 (4H,), fc.weight (3, H), fc.bias (3,).
    Gate block order along the 4H axis is PyTorch's (i, f, g, o).
    """
    k = jax.random.split(key, 6)
    s = 1.0 / jnp.sqrt(hidden)
    w_ih = jax.random.uniform(k[0], (4 * hidden, input_size), jnp.float32, -s, s)
    w_hh = jax.random.uniform(k[1], (4 * hidden, hidden), jnp.float32, -s, s)
    b_ih = jax.random.uniform(k[2], (4 * hidden,), jnp.float32, -s, s)
    b_hh = jax.random.uniform(k[3], (4 * hidden,), jnp.float32, -s, s)
    w_fc = jax.random.uniform(k[4], (out_size, hidden), jnp.float32, -s, s)
    b_fc = jax.random.uniform(k[5], (out_size,), jnp.float32, -s, s)
    return w_ih, w_hh, b_ih, b_hh, w_fc, b_fc


def prepare_kernel_params(raw):
    """Transpose, fold biases, reorder gates (i,f,g,o)->(i,f,o,g). All f32."""
    w_ih, w_hh, b_ih, b_hh, w_fc, b_fc = raw
    H = w_hh.shape[1]
    perm = jnp.concatenate([
        jnp.arange(0 * H, 2 * H),   # i, f
        jnp.arange(3 * H, 4 * H),   # o
        jnp.arange(2 * H, 3 * H),   # g
    ])
    w_ih_p = w_ih[perm]                     # (4H, I)
    w_hh_p = w_hh[perm]                     # (4H, H)
    b_p = (b_ih + b_hh)[perm]               # (4H,)
    return (w_ih_p.T.astype(jnp.float32),           # (I, 4H)
            w_hh_p.T.astype(jnp.float32),           # (H, 4H)  f32 (no bf16)
            b_p[None, :].astype(jnp.float32),       # (1, 4H)
            w_fc.T.astype(jnp.float32),             # (H, 3)
            b_fc[None, :].astype(jnp.float32))      # (1, 3)


def kinlstm_reference(x, raw_params):
    """Pure-JAX f32 reference matching PyTorch semantics (gate order i,f,g,o)."""
    w_ih, w_hh, b_ih, b_hh, w_fc, b_fc = raw_params
    B = x.shape[0]
    H = w_hh.shape[1]
    w_ih_t, w_hh_t = w_ih.T, w_hh.T
    b = (b_ih + b_hh)[None, :]

    def step(carry, xt):
        h, c = carry
        gates = xt @ w_ih_t + h @ w_hh_t + b
        i = jax.nn.sigmoid(gates[:, 0 * H:1 * H])
        f = jax.nn.sigmoid(gates[:, 1 * H:2 * H])
        g = jnp.tanh(gates[:, 2 * H:3 * H])
        o = jax.nn.sigmoid(gates[:, 3 * H:4 * H])
        c = f * c + i * g
        h = o * jnp.tanh(c)
        return (h, c), None

    h0 = jnp.zeros((B, H), jnp.float32)
    c0 = jnp.zeros((B, H), jnp.float32)
    (h, _), _ = lax.scan(step, (h0, c0), jnp.transpose(x, (1, 0, 2)))
    return h @ w_fc.T + b_fc[None, :]


if __name__ == "__main__":
    B, T, I, H = 2, 8, 3, 32
    key = jax.random.PRNGKey(0)
    kx, kp = jax.random.split(key)

    x = jax.random.normal(kx, (B, T, I), jnp.float32)
    raw_params = init_raw_params(kp, hidden=H, input_size=I, out_size=3)
    kernel_params = prepare_kernel_params(raw_params)

    out = kinlstm_forward(x, kernel_params)
    out = jax.block_until_ready(out)

    ref = kinlstm_reference(x, raw_params)
    assert out.shape == (B, 3)
    # Recurrence is full f32 now; tolerance only covers default matmul-pass
    # precision differences between the Pallas and XLA lowerings (10x tighter
    # than the previous bf16-weight revision).
    assert jnp.allclose(out, ref, atol=2e-3, rtol=2e-3), (out, ref)
    print("KERNEL_OK")
</pallas_src>

<mosaic_0001>
module attributes {stable_mosaic.version = 11 : i64} {
  func.func @_kinlstm_kernel(%arg0: memref<16x3xf32, #tpu.memory_space<vmem>>, %arg1: memref<3x128xf32, #tpu.memory_space<vmem>>, %arg2: memref<32x128xf32, #tpu.memory_space<vmem>>, %arg3: memref<1x128xf32, #tpu.memory_space<vmem>>, %arg4: memref<32x3xf32, #tpu.memory_space<vmem>>, %arg5: memref<1x3xf32, #tpu.memory_space<vmem>>, %arg6: memref<2x3xf32, #tpu.memory_space<vmem>>) attributes {dimension_semantics = [], scalar_prefetch = 0 : i64, scratch_operands = 0 : i64, tpu.core_type = #tpu.core_type<tc>} {
    %c0 = arith.constant 0 : index
    %c0_0 = arith.constant 0 : index
    %0 = vector.load %arg0[%c0, %c0_0] : memref<16x3xf32, #tpu.memory_space<vmem>>, vector<16x3xf32>
    %c0_1 = arith.constant 0 : index
    %c0_2 = arith.constant 0 : index
    %1 = vector.load %arg1[%c0_1, %c0_2] : memref<3x128xf32, #tpu.memory_space<vmem>>, vector<3x128xf32>
    %cst = arith.constant dense<0.000000e+00> : vector<16x128xf32>
    %2 = tpu.matmul %0, %1, %cst {dimension_numbers = #tpu.dot_dimension_numbers<[1], [0], [0], [1], [0, 0, 1, 1], [], []>} : vector<16x3xf32>, vector<3x128xf32>, vector<16x128xf32> -> vector<16x128xf32>
    %c0_3 = arith.constant 0 : index
    %c0_4 = arith.constant 0 : index
    %3 = vector.load %arg3[%c0_3, %c0_4] : memref<1x128xf32, #tpu.memory_space<vmem>>, vector<1x128xf32>
    %4 = vector.broadcast %3 : vector<1x128xf32> to vector<16x128xf32>
    %5 = arith.addf %2, %4 : vector<16x128xf32>
    %c0_5 = arith.constant 0 : index
    %c0_6 = arith.constant 0 : index
    %6 = vector.load %arg2[%c0_5, %c0_6] : memref<32x128xf32, #tpu.memory_space<vmem>>, vector<32x128xf32>
    %cst_7 = arith.constant 0.000000e+00 : f32
    %7 = vector.broadcast %cst_7 : f32 to vector<2x32xf32>
    %cst_8 = arith.constant 0.000000e+00 : f32
    %8 = vector.broadcast %cst_8 : f32 to vector<2x32xf32>
    %9 = vector.extract_strided_slice %5 {offsets = [0, 0], sizes = [2, 128], strides = [1, 1]} : vector<16x128xf32> to vector<2x128xf32>
    %cst_9 = arith.constant dense<0.000000e+00> : vector<2x128xf32>
    %10 = tpu.matmul %7, %6, %cst_9 {dimension_numbers = #tpu.dot_dimension_numbers<[1], [0], [0], [1], [0, 0, 1, 1], [], []>} : vector<2x32xf32>, vector<32x128xf32>, vector<2x128xf32> -> vector<2x128xf32>
    %11 = arith.addf %9, %10 : vector<2x128xf32>
    %12 = vector.extract_strided_slice %11 {offsets = [0, 0], sizes = [2, 96], strides = [1, 1]} : vector<2x128xf32> to vector<2x96xf32>
    %13 = arith.negf %12 : vector<2x96xf32>
    %14 = math.exp %13 : vector<2x96xf32>
    %cst_10 = arith.constant 1.000000e+00 : f32
    %15 = vector.broadcast %cst_10 : f32 to vector<2x96xf32>
    %16 = arith.addf %15, %14 : vector<2x96xf32>
    %17 = arith.divf %15, %16 : vector<2x96xf32>
    %18 = vector.extract_strided_slice %11 {offsets = [0, 96], sizes = [2, 32], strides = [1, 1]} : vector<2x128xf32> to vector<2x32xf32>
    %19 = math.tanh %18 : vector<2x32xf32>
    %20 = vector.extract_strided_slice %17 {offsets = [0, 0], sizes = [2, 32], strides = [1, 1]} : vector<2x96xf32> to vector<2x32xf32>
    %21 = vector.extract_strided_slice %17 {offsets = [0, 32], sizes = [2, 32], strides = [1, 1]} : vector<2x96xf32> to vector<2x32xf32>
    %22 = vector.extract_strided_slice %17 {offsets = [0, 64], sizes = [2, 32], strides = [1, 1]} : vector<2x96xf32> to vector<2x32xf32>
    %23 = arith.mulf %21, %8 : vector<2x32xf32>
    %24 = arith.mulf %20, %19 : vector<2x32xf32>
    %25 = arith.addf %23, %24 : vector<2x32xf32>
    %26 = math.tanh %25 : vector<2x32xf32>
    %27 = arith.mulf %22, %26 : vector<2x32xf32>
    %28 = vector.extract_strided_slice %5 {offsets = [2, 0], sizes = [2, 128], strides = [1, 1]} : vector<16x128xf32> to vector<2x128xf32>
    %cst_11 = arith.constant dense<0.000000e+00> : vector<2x128xf32>
    %29 = tpu.matmul %27, %6, %cst_11 {dimension_numbers = #tpu.dot_dimension_numbers<[1], [0], [0], [1], [0, 0, 1, 1], [], []>} : vector<2x32xf32>, vector<32x128xf32>, vector<2x128xf32> -> vector<2x128xf32>
    %30 = arith.addf %28, %29 : vector<2x128xf32>
    %31 = vector.extract_strided_slice %30 {offsets = [0, 0], sizes = [2, 96], strides = [1, 1]} : vector<2x128xf32> to vector<2x96xf32>
    %32 = arith.negf %31 : vector<2x96xf32>
    %33 = math.exp %32 : vector<2x96xf32>
    %cst_12 = arith.constant 1.000000e+00 : f32
    %34 = vector.broadcast %cst_12 : f32 to vector<2x96xf32>
    %35 = arith.addf %34, %33 : vector<2x96xf32>
    %36 = arith.divf %34, %35 : vector<2x96xf32>
    %37 = vector.extract_strided_slice %30 {offsets = [0, 96], sizes = [2, 32], strides = [1, 1]} : vector<2x128xf32> to vector<2x32xf32>
    %38 = math.tanh %37 : vector<2x32xf32>
    %39 = vector.extract_strided_slice %36 {offsets = [0, 0], sizes = [2, 32], strides = [1, 1]} : vector<2x96xf32> to vector<2x32xf32>
    %40 = vector.extract_strided_slice %36 {offsets = [0, 32], sizes = [2, 32], strides = [1, 1]} : vector<2x96xf32> to vector<2x32xf32>
    %41 = vector.extract_strided_slice %36 {offsets = [0, 64], sizes = [2, 32], strides = [1, 1]} : vector<2x96xf32> to vector<2x32xf32>
    %42 = arith.mulf %40, %25 : vector<2x32xf32>
    %43 = arith.mulf %39, %38 : vector<2x32xf32>
    %44 = arith.addf %42, %43 : vector<2x32xf32>
    %45 = math.tanh %44 : vector<2x32xf32>
    %46 = arith.mulf %41, %45 : vector<2x32xf32>
    %47 = vector.extract_strided_slice %5 {offsets = [4, 0], sizes = [2, 128], strides = [1, 1]} : vector<16x128xf32> to vector<2x128xf32>
    %cst_13 = arith.constant dense<0.000000e+00> : vector<2x128xf32>
    %48 = tpu.matmul %46, %6, %cst_13 {dimension_numbers = #tpu.dot_dimension_numbers<[1], [0], [0], [1], [0, 0, 1, 1], [], []>} : vector<2x32xf32>, vector<32x128xf32>, vector<2x128xf32> -> vector<2x128xf32>
    %49 = arith.addf %47, %48 : vector<2x128xf32>
    %50 = vector.extract_strided_slice %49 {offsets = [0, 0], sizes = [2, 96], strides = [1, 1]} : vector<2x128xf32> to vector<2x96xf32>
    %51 = arith.negf %50 : vector<2x96xf32>
    %52 = math.exp %51 : vector<2x96xf32>
    %cst_14 = arith.constant 1.000000e+00 : f32
    %53 = vector.broadcast %cst_14 : f32 to vector<2x96xf32>
    %54 = arith.addf %53, %52 : vector<2x96xf32>
    %55 = arith.divf %53, %54 : vector<2x96xf32>
    %56 = vector.extract_strided_slice %49 {offsets = [0, 96], sizes = [2, 32], strides = [1, 1]} : vector<2x128xf32> to vector<2x32xf32>
    %57 = math.tanh %56 : vector<2x32xf32>
    %58 = vector.extract_strided_slice %55 {offsets = [0, 0], sizes = [2, 32], strides = [1, 1]} : vector<2x96xf32> to vector<2x32xf32>
    %59 = vector.extract_strided_slice %55 {offsets = [0, 32], sizes = [2, 32], strides = [1, 1]} : vector<2x96xf32> to vector<2x32xf32>
    %60 = vector.extract_strided_slice %55 {offsets = [0, 64], sizes = [2, 32], strides = [1, 1]} : vector<2x96xf32> to vector<2x32xf32>
    %61 = arith.mulf %59, %44 : vector<2x32xf32>
    %62 = arith.mulf %58, %57 : vector<2x32xf32>
    %63 = arith.addf %61, %62 : vector<2x32xf32>
    %64 = math.tanh %63 : vector<2x32xf32>
    %65 = arith.mulf %60, %64 : vector<2x32xf32>
    %66 = vector.extract_strided_slice %5 {offsets = [6, 0], sizes = [2, 128], strides = [1, 1]} : vector<16x128xf32> to vector<2x128xf32>
    %cst_15 = arith.constant dense<0.000000e+00> : vector<2x128xf32>
    %67 = tpu.matmul %65, %6, %cst_15 {dimension_numbers = #tpu.dot_dimension_numbers<[1], [0], [0], [1], [0, 0, 1, 1], [], []>} : vector<2x32xf32>, vector<32x128xf32>, vector<2x128xf32> -> vector<2x128xf32>
    %68 = arith.addf %66, %67 : vector<2x128xf32>
    %69 = vector.extract_strided_slice %68 {offsets = [0, 0], sizes = [2, 96], strides = [1, 1]} : vector<2x128xf32> to vector<2x96xf32>
    %70 = arith.negf %69 : vector<2x96xf32>
    %71 = math.exp %70 : vector<2x96xf32>
    %cst_16 = arith.constant 1.000000e+00 : f32
    %72 = vector.broadcast %cst_16 : f32 to vector<2x96xf32>
    %73 = arith.addf %72, %71 : vector<2x96xf32>
    %74 = arith.divf %72, %73 : vector<2x96xf32>
    %75 = vector.extract_strided_slice %68 {offsets = [0, 96], sizes = [2, 32], strides = [1, 1]} : vector<2x128xf32> to vector<2x32xf32>
    %76 = math.tanh %75 : vector<2x32xf32>
    %77 = vector.extract_strided_slice %74 {offsets = [0, 0], sizes = [2, 32], strides = [1, 1]} : vector<2x96xf32> to vector<2x32xf32>
    %78 = vector.extract_strided_slice %74 {offsets = [0, 32], sizes = [2, 32], strides = [1, 1]} : vector<2x96xf32> to vector<2x32xf32>
    %79 = vector.extract_strided_slice %74 {offsets = [0, 64], sizes = [2, 32], strides = [1, 1]} : vector<2x96xf32> to vector<2x32xf32>
    %80 = arith.mulf %78, %63 : vector<2x32xf32>
    %81 = arith.mulf %77, %76 : vector<2x32xf32>
    %82 = arith.addf %80, %81 : vector<2x32xf32>
    %83 = math.tanh %82 : vector<2x32xf32>
    %84 = arith.mulf %79, %83 : vector<2x32xf32>
    %85 = vector.extract_strided_slice %5 {offsets = [8, 0], sizes = [2, 128], strides = [1, 1]} : vector<16x128xf32> to vector<2x128xf32>
    %cst_17 = arith.constant dense<0.000000e+00> : vector<2x128xf32>
    %86 = tpu.matmul %84, %6, %cst_17 {dimension_numbers = #tpu.dot_dimension_numbers<[1], [0], [0], [1], [0, 0, 1, 1], [], []>} : vector<2x32xf32>, vector<32x128xf32>, vector<2x128xf32> -> vector<2x128xf32>
    %87 = arith.addf %85, %86 : vector<2x128xf32>
    %88 = vector.extract_strided_slice %87 {offsets = [0, 0], sizes = [2, 96], strides = [1, 1]} : vector<2x128xf32> to vector<2x96xf32>
    %89 = arith.negf %88 : vector<2x96xf32>
    %90 = math.exp %89 : vector<2x96xf32>
    %cst_18 = arith.constant 1.000000e+00 : f32
    %91 = vector.broadcast %cst_18 : f32 to vector<2x96xf32>
    %92 = arith.addf %91, %90 : vector<2x96xf32>
    %93 = arith.divf %91, %92 : vector<2x96xf32>
    %94 = vector.extract_strided_slice %87 {offsets = [0, 96], sizes = [2, 32], strides = [1, 1]} : vector<2x128xf32> to vector<2x32xf32>
    %95 = math.tanh %94 : vector<2x32xf32>
    %96 = vector.extract_strided_slice %93 {offsets = [0, 0], sizes = [2, 32], strides = [1, 1]} : vector<2x96xf32> to vector<2x32xf32>
    %97 = vector.extract_strided_slice %93 {offsets = [0, 32], sizes = [2, 32], strides = [1, 1]} : vector<2x96xf32> to vector<2x32xf32>
    %98 = vector.extract_strided_slice %93 {offsets = [0, 64], sizes = [2, 32], strides = [1, 1]} : vector<2x96xf32> to vector<2x32xf32>
    %99 = arith.mulf %97, %82 : vector<2x32xf32>
    %100 = arith.mulf %96, %95 : vector<2x32xf32>
    %101 = arith.addf %99, %100 : vector<2x32xf32>
    %102 = math.tanh %101 : vector<2x32xf32>
    %103 = arith.mulf %98, %102 : vector<2x32xf32>
    %104 = vector.extract_strided_slice %5 {offsets = [10, 0], sizes = [2, 128], strides = [1, 1]} : vector<16x128xf32> to vector<2x128xf32>
    %cst_19 = arith.constant dense<0.000000e+00> : vector<2x128xf32>
    %105 = tpu.matmul %103, %6, %cst_19 {dimension_numbers = #tpu.dot_dimension_numbers<[1], [0], [0], [1], [0, 0, 1, 1], [], []>} : vector<2x32xf32>, vector<32x128xf32>, vector<2x128xf32> -> vector<2x128xf32>
    %106 = arith.addf %104, %105 : vector<2x128xf32>
    %107 = vector.extract_strided_slice %106 {offsets = [0, 0], sizes = [2, 96], strides = [1, 1]} : vector<2x128xf32> to vector<2x96xf32>
    %108 = arith.negf %107 : vector<2x96xf32>
    %109 = math.exp %108 : vector<2x96xf32>
    %cst_20 = arith.constant 1.000000e+00 : f32
    %110 = vector.broadcast %cst_20 : f32 to vector<2x96xf32>
    %111 = arith.addf %110, %109 : vector<2x96xf32>
    %112 = arith.divf %110, %111 : vector<2x96xf32>
    %113 = vector.extract_strided_slice %106 {offsets = [0, 96], sizes = [2, 32], strides = [1, 1]} : vector<2x128xf32> to vector<2x32xf32>
    %114 = math.tanh %113 : vector<2x32xf32>
    %115 = vector.extract_strided_slice %112 {offsets = [0, 0], sizes = [2, 32], strides = [1, 1]} : vector<2x96xf32> to vector<2x32xf32>
    %116 = vector.extract_strided_slice %112 {offsets = [0, 32], sizes = [2, 32], strides = [1, 1]} : vector<2x96xf32> to vector<2x32xf32>
    %117 = vector.extract_strided_slice %112 {offsets = [0, 64], sizes = [2, 32], strides = [1, 1]} : vector<2x96xf32> to vector<2x32xf32>
    %118 = arith.mulf %116, %101 : vector<2x32xf32>
    %119 = arith.mulf %115, %114 : vector<2x32xf32>
    %120 = arith.addf %118, %119 : vector<2x32xf32>
    %121 = math.tanh %120 : vector<2x32xf32>
    %122 = arith.mulf %117, %121 : vector<2x32xf32>
    %123 = vector.extract_strided_slice %5 {offsets = [12, 0], sizes = [2, 128], strides = [1, 1]} : vector<16x128xf32> to vector<2x128xf32>
    %cst_21 = arith.constant dense<0.000000e+00> : vector<2x128xf32>
    %124 = tpu.matmul %122, %6, %cst_21 {dimension_numbers = #tpu.dot_dimension_numbers<[1], [0], [0], [1], [0, 0, 1, 1], [], []>} : vector<2x32xf32>, vector<32x128xf32>, vector<2x128xf32> -> vector<2x128xf32>
    %125 = arith.addf %123, %124 : vector<2x128xf32>
    %126 = vector.extract_strided_slice %125 {offsets = [0, 0], sizes = [2, 96], strides = [1, 1]} : vector<2x128xf32> to vector<2x96xf32>
    %127 = arith.negf %126 : vector<2x96xf32>
    %128 = math.exp %127 : vector<2x96xf32>
    %cst_22 = arith.constant 1.000000e+00 : f32
    %129 = vector.broadcast %cst_22 : f32 to vector<2x96xf32>
    %130 = arith.addf %129, %128 : vector<2x96xf32>
    %131 = arith.divf %129, %130 : vector<2x96xf32>
    %132 = vector.extract_strided_slice %125 {offsets = [0, 96], sizes = [2, 32], strides = [1, 1]} : vector<2x128xf32> to vector<2x32xf32>
    %133 = math.tanh %132 : vector<2x32xf32>
    %134 = vector.extract_strided_slice %131 {offsets = [0, 0], sizes = [2, 32], strides = [1, 1]} : vector<2x96xf32> to vector<2x32xf32>
    %135 = vector.extract_strided_slice %131 {offsets = [0, 32], sizes = [2, 32], strides = [1, 1]} : vector<2x96xf32> to vector<2x32xf32>
    %136 = vector.extract_strided_slice %131 {offsets = [0, 64], sizes = [2, 32], strides = [1, 1]} : vector<2x96xf32> to vector<2x32xf32>
    %137 = arith.mulf %135, %120 : vector<2x32xf32>
    %138 = arith.mulf %134, %133 : vector<2x32xf32>
    %139 = arith.addf %137, %138 : vector<2x32xf32>
    %140 = math.tanh %139 : vector<2x32xf32>
    %141 = arith.mulf %136, %140 : vector<2x32xf32>
    %142 = vector.extract_strided_slice %5 {offsets = [14, 0], sizes = [2, 128], strides = [1, 1]} : vector<16x128xf32> to vector<2x128xf32>
    %cst_23 = arith.constant dense<0.000000e+00> : vector<2x128xf32>
    %143 = tpu.matmul %141, %6, %cst_23 {dimension_numbers = #tpu.dot_dimension_numbers<[1], [0], [0], [1], [0, 0, 1, 1], [], []>} : vector<2x32xf32>, vector<32x128xf32>, vector<2x128xf32> -> vector<2x128xf32>
    %144 = arith.addf %142, %143 : vector<2x128xf32>
    %145 = vector.extract_strided_slice %144 {offsets = [0, 0], sizes = [2, 96], strides = [1, 1]} : vector<2x128xf32> to vector<2x96xf32>
    %146 = arith.negf %145 : vector<2x96xf32>
    %147 = math.exp %146 : vector<2x96xf32>
    %cst_24 = arith.constant 1.000000e+00 : f32
    %148 = vector.broadcast %cst_24 : f32 to vector<2x96xf32>
    %149 = arith.addf %148, %147 : vector<2x96xf32>
    %150 = arith.divf %148, %149 : vector<2x96xf32>
    %151 = vector.extract_strided_slice %144 {offsets = [0, 96], sizes = [2, 32], strides = [1, 1]} : vector<2x128xf32> to vector<2x32xf32>
    %152 = math.tanh %151 : vector<2x32xf32>
    %153 = vector.extract_strided_slice %150 {offsets = [0, 0], sizes = [2, 32], strides = [1, 1]} : vector<2x96xf32> to vector<2x32xf32>
    %154 = vector.extract_strided_slice %150 {offsets = [0, 32], sizes = [2, 32], strides = [1, 1]} : vector<2x96xf32> to vector<2x32xf32>
    %155 = vector.extract_strided_slice %150 {offsets = [0, 64], sizes = [2, 32], strides = [1, 1]} : vector<2x96xf32> to vector<2x32xf32>
    %156 = arith.mulf %154, %139 : vector<2x32xf32>
    %157 = arith.mulf %153, %152 : vector<2x32xf32>
    %158 = arith.addf %156, %157 : vector<2x32xf32>
    %159 = math.tanh %158 : vector<2x32xf32>
    %160 = arith.mulf %155, %159 : vector<2x32xf32>
    %c0_25 = arith.constant 0 : index
    %c0_26 = arith.constant 0 : index
    %161 = vector.load %arg4[%c0_25, %c0_26] : memref<32x3xf32, #tpu.memory_space<vmem>>, vector<32x3xf32>
    %cst_27 = arith.constant dense<0.000000e+00> : vector<2x3xf32>
    %162 = tpu.matmul %160, %161, %cst_27 {dimension_numbers = #tpu.dot_dimension_numbers<[1], [0], [0], [1], [0, 0, 1, 1], [], []>} : vector<2x32xf32>, vector<32x3xf32>, vector<2x3xf32> -> vector<2x3xf32>
    %c0_28 = arith.constant 0 : index
    %c0_29 = arith.constant 0 : index
    %163 = vector.load %arg5[%c0_28, %c0_29] : memref<1x3xf32, #tpu.memory_space<vmem>>, vector<1x3xf32>
    %164 = vector.broadcast %163 : vector<1x3xf32> to vector<2x3xf32>
    %165 = arith.addf %162, %164 : vector<2x3xf32>
    %c0_30 = arith.constant 0 : index
    %c0_31 = arith.constant 0 : index
    %166 = vector.load %arg6[%c0_30, %c0_31] : memref<2x3xf32, #tpu.memory_space<vmem>>, vector<2x3xf32>
    tpu.vector_store %arg6[%c0_30, %c0_31], %165 {strides = array<i32>} : memref<2x3xf32, #tpu.memory_space<vmem>>, vector<2x3xf32>,
    return
  }
}

</mosaic_0001>

<bundles_post_ra>
// kernel: tpu_custom_call.1
= control target key start
LH: loop header
LB: loop body
LE: loop exit
PB: predicated region body
PF: predicated region fallthrough
CT: control target
= control target key end

     0   :  { %vm41_vm0 = vcmask 1042432   ;;  %vm34_vm1 = vcmask 23552   ;;  %v1334_v2 = vmov 0.0   ;;  %s1563_s0 = inlined_call_operand.vmem [shape: f32[16,3], index: 0, kind: input, shape index: {}]   ;;  %s1564_s1 = inlined_call_operand.vmem [shape: f32[3,128], index: 1, kind: input, shape index: {}]   ;;  %s1565_s2 = inlined_call_operand.vmem [shape: f32[32,128], index: 2, kind: input, shape index: {}]   ;;  %s1566_s3 = inlined_call_operand.vmem [shape: f32[1,128], index: 3, kind: input, shape index: {}]   ;;  %s1567_s4 = inlined_call_operand.vmem [shape: f32[32,3], index: 4, kind: input, shape index: {}]   ;;  %s1568_s5 = inlined_call_operand.vmem [shape: f32[1,3], index: 5, kind: input, shape index: {}]   ;;  %s1569_s6 = inlined_call_operand.hbm [shape: f32[2,3], index: 6, kind: output, shape index: {}]  }
   0x1   :  { %v26_v0 = vld [vmem:[%s1564_s1] sm:$0x7]  ;;  %1144 = vmatprep.subr.mxu1 %v1334_v2  ;;  %v1384_v3 = vld [vmem:[%s1565_s2 + $0x18] sm:$0xff]  ;;  %v25_v4 = vld [vmem:[%s1563_s0 + $0x8] sm:$0xff] }
   0x2   :  { %v24_v1 = vld [vmem:[%s1563_s0] sm:$0xff]  ;;  %1139 = vmatprep.subr.msk.mxu0 %vm41_vm0, %v26_v0  ;;  %v1392_v5 = vld [vmem:[%s1565_s2 + $0x10] sm:$0xff] }
   0x3   :  { %1140 = vmatpush3.msk.msra.mxu0 %vm41_vm0, %v26_v0  ;;  %1141 = vmatprep.mubr.msk.f32.mxu0 %vm34_vm1, %v24_v1 }
   0x4   :  { %11 = vsyncpa [#allocation3], 0  ;;  %1145 = vmatpush3.msra.mxu1 %v1384_v3  ;;  %1142 = vmatmul.mubr.msk.f32.vlgmr.msra.gmra.mxu0 %vm34_vm1, %v25_v4  ;;  %v1399_v6 = vld [vmem:[%s1565_s2 + $0x8] sm:$0xff]  ;;  %vm1335_vm2 = vmmov 0   ;;  %v1409_v7 = vld [vmem:[%s1565_s2] sm:$0xff]  ;;  %s1336_s10 = smov 32  }
   0x5   :  { %1146 = vmatprep.subr.mxu1 %v1334_v2  ;;  %1152 = vmatprep.mubr.msk.f32.mxu1 %vm1335_vm2, %v1334_v2  ;;  %v1070_v8 = vld [vmem:[%s1566_s3] ss:$0 sm:$0xff]  ;;  %s1337_s3 = smov 64   ;;  %vm124_vm3 = vcmask 261120   ;;  %vm1054_vm4 = vcmask 17408  }
   0x6   :  { %1147 = vmatpush3.msra.mxu1 %v1392_v5  ;;  %1155 = vmatprep.subr.mxu0 %v1334_v2 }
   0x7   :  { %1148 = vmatprep.subr.mxu1 %v1334_v2  ;;  %1156 = vmatpush3.msra.mxu0 %v1384_v3 }
   0x8   :  { %1149 = vmatpush3.msra.mxu1 %v1399_v6  ;;  %1157 = vmatprep.subr.mxu0 %v1334_v2 }
   0x9   :  { %1150 = vmatprep.subr.mxu1 %v1334_v2  ;;  %1158 = vmatpush3.msra.mxu0 %v1392_v5 }
   0xa   :  { %1151 = vmatpush3.msra.mxu1 %v1409_v7  ;;  %1159 = vmatprep.subr.mxu0 %v1334_v2 }
   0xb   :  { %1153 = vmatmul.mubr.f32.vlgmr.msra.gmra.mxu1 %v1334_v2  ;;  %1160 = vmatpush3.msra.mxu0 %v1399_v6 }
   0xc   :  { %1161 = vmatprep.subr.mxu0 %v1334_v2  ;;  %1163 = vmatprep.mubr.msk.f32.mxu0 %vm1335_vm2, %v1334_v2 }
   0xd   :  { %1162 = vmatpush3.msra.mxu0 %v1409_v7  ;;  %1166 = vmatprep.subr.mxu1 %v1334_v2 }
   0xe   :  { %1167 = vmatpush3.msra.mxu1 %v1384_v3  ;;  %1174 = vmatprep.mubr.msk.f32.mxu1 %vm1335_vm2, %v1334_v2 }
   0xf   :  { %1168 = vmatprep.subr.mxu1 %v1334_v2  ;;  %1177 = vmatprep.subr.mxu0 %v1334_v2 }
  0x10   :  { %1169 = vmatpush3.msra.mxu1 %v1392_v5 }
  0x11   :  { %1170 = vmatprep.subr.mxu1 %v1334_v2 }
  0x12   :  { %1171 = vmatpush3.msra.mxu1 %v1399_v6 }
  0x13   :  { %1172 = vmatprep.subr.mxu1 %v1334_v2 }
  0x14   :  { %1173 = vmatpush3.msra.mxu1 %v1409_v7 }
  0x15   :  { %1188 = vmatprep.subr.mxu1 %v1334_v2 }
  0xc4   :  { %v1143_v9 = vpop.f32.mrf.mxu0 }
  0xc5   :  { %v1439_v10 = vadd.f32 %v1143_v9, %v1070_v8 }
  0xc6   :  { %v111_v11 = vpop.f32.mrf.mxu0 }
  0xc7   :  { %v1441_v12 = vadd.f32 %v1070_v8, %v111_v11 }
  0xcb   :  { %v194_v13 = vpop.f32.mrf.mxu1 }
  0xcc   :  { %v198_v14 = vadd.f32 %v194_v13, %v1441_v12 }
  0xcd   :  { %v1154_v15 = vpop.f32.mrf.mxu1 }
  0xce   :  { %1248 = vtanh.f32 %v198_v14  ;;  %v1074_v17 = vmul.f32 -1.442695, %v198_v14 }
  0xd0   :  { %1250 = vpow2.f32 %v1074_v17 }
  0xdb   :  { %v1249_v16 = vpop.eup %1248 }
  0xdc   :  { %208 = vrot.lane.b32.xlu0 %v1249_v16, %s1336_s10 }
  0xdd   :  { %v1251_v18 = vpop.eup %1250 }
  0xde   :  { %v202_v19 = vadd.f32 1.0, %v1251_v18 }
  0xe0   :  { %1252 = vrcp.f32 %v202_v19 }
  0xed   :  { %v1253_v20 = vpop.eup %1252 }
  0xee   :  { %v206_v23 = vmul.f32 0.0, %v1253_v20 }
 0x14e   :  { %v209_v21 = vpop.permute.xlu0 %208 }
 0x14f   :  { %v211_v22 = vmul.f32 %v1253_v20, %v209_v21 }
 0x151   :  { %213 = vrot.lane.b32.xlu0 %v211_v22, %s1336_s10 }
 0x1c3   :  { %v214_v24 = vpop.permute.xlu0 %213 }
 0x1c4   :  { %v216_v25 = vadd.f32 %v214_v24, %v206_v23 }
 0x1c6   :  { %1254 = vtanh.f32 %v216_v25  ;;  %v310_v41 = vrot.slane %v216_v25, 6 }
 0x1d3   :  { %v1255_v26 = vpop.eup %1254 }
 0x1d4   :  { %219 = vrot.lane.b32.xlu1 %v1255_v26, %s1336_s10 }
 0x246   :  { %v220_v27 = vpop.permute.xlu1 %219 }
 0x247   :  { %v222_v28 = vmul.f32 %v1253_v20, %v220_v27 }
 0x249   :  { %224 = vrot.lane.b32.xlu1 %v222_v28, %s1337_s3 }
 0x2bb   :  { %v225_v29 = vpop.permute.xlu1 %224 }
 0x2bc   :  { %1164 = vmatmul.mubr.msk.f32.vlgmr.msra.gmra.mxu0 %vm124_vm3, %v225_v29 }
 0x2bd   :  { %1178 = vmatpush3.msra.mxu0 %v1384_v3  ;;  %1185 = vmatprep.mubr.msk.f32.mxu0 %vm1335_vm2, %v1334_v2 }
 0x2be   :  { %1179 = vmatprep.subr.mxu0 %v1334_v2 }
 0x2bf   :  { %1180 = vmatpush3.msra.mxu0 %v1392_v5 }
 0x2c0   :  { %1181 = vmatprep.subr.mxu0 %v1334_v2 }
 0x2c1   :  { %1182 = vmatpush3.msra.mxu0 %v1399_v6 }
 0x2c2   :  { %1183 = vmatprep.subr.mxu0 %v1334_v2 }
 0x2c3   :  { %1184 = vmatpush3.msra.mxu0 %v1409_v7 }
 0x2c4   :  { %1199 = vmatprep.subr.mxu0 %v1334_v2 }
 0x37c   :  { %v294_v30 = vpop.f32.mrf.mxu0 }
 0x37d   :  { %v299_v31 = vrot.slane %v294_v30, 6 }
 0x37e   :  { %v1165_v32 = vpop.f32.mrf.mxu0 }
 0x37f   :  { %v301_v33 = vadd.f32 %v299_v31, %v1441_v12 }
 0x381   :  { %1256 = vtanh.f32 %v301_v33  ;;  %v1076_v35 = vmul.f32 -1.442695, %v301_v33 }
 0x383   :  { %1258 = vpow2.f32 %v1076_v35 }
 0x38e   :  { %v1257_v34 = vpop.eup %1256 }
 0x38f   :  { %314 = vrot.lane.b32.xlu0 %v1257_v34, %s1336_s10 }
 0x390   :  { %v1259_v36 = vpop.eup %1258 }
 0x391   :  { %v305_v37 = vadd.f32 1.0, %v1259_v36 }
 0x393   :  { %1260 = vrcp.f32 %v305_v37 }
 0x3a0   :  { %v1261_v38 = vpop.eup %1260 }
 0x3a1   :  { %v312_v42 = vmul.f32 %v1261_v38, %v310_v41 }
 0x401   :  { %v315_v39 = vpop.permute.xlu0 %314 }
 0x402   :  { %v317_v40 = vmul.f32 %v1261_v38, %v315_v39 }
 0x404   :  { %319 = vrot.lane.b32.xlu1 %v317_v40, %s1336_s10 }
 0x476   :  { %v320_v43 = vpop.permute.xlu1 %319 }
 0x477   :  { %v322_v44 = vadd.f32 %v320_v43, %v312_v42 }
 0x479   :  { %1262 = vtanh.f32 %v322_v44  ;;  %v417_v61 = vrot.slane %v322_v44, 6 }
 0x486   :  { %v1263_v45 = vpop.eup %1262 }
 0x487   :  { %325 = vrot.lane.b32.xlu0 %v1263_v45, %s1336_s10 }
 0x4f9   :  { %v326_v46 = vpop.permute.xlu0 %325 }
 0x4fa   :  { %v328_v47 = vmul.f32 %v1261_v38, %v326_v46 }
 0x4fc   :  { %v330_v48 = vrot.slane %v328_v47, 2 }
 0x4fe   :  { %331 = vrot.lane.b32.xlu1 %v330_v48, %s1337_s3 }
 0x570   :  { %v332_v49 = vpop.permute.xlu1 %331 }
 0x571   :  { %1175 = vmatmul.mubr.msk.f32.vlgmr.msra.gmra.mxu1 %vm124_vm3, %v332_v49 }
 0x572   :  { %1189 = vmatpush3.msra.mxu1 %v1384_v3  ;;  %1196 = vmatprep.mubr.msk.f32.mxu1 %vm1335_vm2, %v1334_v2 }
 0x573   :  { %1190 = vmatprep.subr.mxu1 %v1334_v2 }
 0x574   :  { %1191 = vmatpush3.msra.mxu1 %v1392_v5 }
 0x575   :  { %1192 = vmatprep.subr.mxu1 %v1334_v2 }
 0x576   :  { %1193 = vmatpush3.msra.mxu1 %v1399_v6 }
 0x577   :  { %1194 = vmatprep.subr.mxu1 %v1334_v2 }
 0x578   :  { %1195 = vmatpush3.msra.mxu1 %v1409_v7 }
 0x579   :  { %1210 = vmatprep.subr.mxu1 %v1334_v2 }
 0x631   :  { %v401_v50 = vpop.f32.mrf.mxu1 }
 0x632   :  { %v406_v51 = vrot.slane %v401_v50, 4 }
 0x633   :  { %v1176_v52 = vpop.f32.mrf.mxu1 }
 0x634   :  { %v408_v53 = vadd.f32 %v406_v51, %v1441_v12 }
 0x636   :  { %1264 = vtanh.f32 %v408_v53  ;;  %v1078_v55 = vmul.f32 -1.442695, %v408_v53 }
 0x638   :  { %1266 = vpow2.f32 %v1078_v55 }
 0x643   :  { %v1265_v54 = vpop.eup %1264 }
 0x644   :  { %421 = vrot.lane.b32.xlu0 %v1265_v54, %s1336_s10 }
 0x645   :  { %v1267_v56 = vpop.eup %1266 }
 0x646   :  { %v412_v57 = vadd.f32 1.0, %v1267_v56 }
 0x648   :  { %1268 = vrcp.f32 %v412_v57 }
 0x655   :  { %v1269_v58 = vpop.eup %1268 }
 0x656   :  { %v419_v62 = vmul.f32 %v1269_v58, %v417_v61 }
 0x6b6   :  { %v422_v59 = vpop.permute.xlu0 %421 }
 0x6b7   :  { %v424_v60 = vmul.f32 %v1269_v58, %v422_v59 }
 0x6b9   :  { %426 = vrot.lane.b32.xlu1 %v424_v60, %s1336_s10 }
 0x72b   :  { %v427_v63 = vpop.permute.xlu1 %426 }
 0x72c   :  { %v429_v0 = vadd.f32 %v427_v63, %v419_v62 }
 0x72e   :  { %1270 = vtanh.f32 %v429_v0  ;;  %v524_v24 = vrot.slane %v429_v0, 6 }
 0x73b   :  { %v1271_v1 = vpop.eup %1270 }
 0x73c   :  { %432 = vrot.lane.b32.xlu0 %v1271_v1, %s1336_s10 }
 0x7ae   :  { %v433_v4 = vpop.permute.xlu0 %432 }
 0x7af   :  { %v435_v8 = vmul.f32 %v1269_v58, %v433_v4 }
 0x7b1   :  { %v437_v9 = vrot.slane %v435_v8, 4 }
 0x7b3   :  { %438 = vrot.lane.b32.xlu1 %v437_v9, %s1337_s3 }
 0x825   :  { %v439_v11 = vpop.permute.xlu1 %438 }
 0x826   :  { %1186 = vmatmul.mubr.msk.f32.vlgmr.msra.gmra.mxu0 %vm124_vm3, %v439_v11 }
 0x827   :  { %1200 = vmatpush3.msra.mxu0 %v1384_v3  ;;  %1207 = vmatprep.mubr.msk.f32.mxu0 %vm1335_vm2, %v1334_v2 }
 0x828   :  { %1201 = vmatprep.subr.mxu0 %v1334_v2 }
 0x829   :  { %1202 = vmatpush3.msra.mxu0 %v1392_v5 }
 0x82a   :  { %1203 = vmatprep.subr.mxu0 %v1334_v2 }
 0x82b   :  { %1204 = vmatpush3.msra.mxu0 %v1399_v6 }
 0x82c   :  { %1205 = vmatprep.subr.mxu0 %v1334_v2 }
 0x82d   :  { %1206 = vmatpush3.msra.mxu0 %v1409_v7 }
 0x82e   :  { %1221 = vmatprep.subr.mxu0 %v1334_v2 }
 0x8e6   :  { %v508_v13 = vpop.f32.mrf.mxu0 }
 0x8e7   :  { %v513_v14 = vrot.slane %v508_v13, 2 }
 0x8e8   :  { %v1187_v15 = vpop.f32.mrf.mxu0 }
 0x8e9   :  { %v515_v16 = vadd.f32 %v513_v14, %v1441_v12 }
 0x8eb   :  { %1272 = vtanh.f32 %v515_v16  ;;  %v1080_v18 = vmul.f32 -1.442695, %v515_v16 }
 0x8ed   :  { %1274 = vpow2.f32 %v1080_v18 }
 0x8f8   :  { %v1273_v17 = vpop.eup %1272 }
 0x8f9   :  { %528 = vrot.lane.b32.xlu0 %v1273_v17, %s1336_s10 }
 0x8fa   :  { %v1275_v19 = vpop.eup %1274 }
 0x8fb   :  { %v519_v20 = vadd.f32 1.0, %v1275_v19 }
 0x8fd   :  { %1276 = vrcp.f32 %v519_v20 }
 0x90a   :  { %v1277_v21 = vpop.eup %1276 }
 0x90b   :  { %v526_v25 = vmul.f32 %v1277_v21, %v524_v24 }
 0x96b   :  { %v529_v22 = vpop.permute.xlu0 %528 }
 0x96c   :  { %v531_v23 = vmul.f32 %v1277_v21, %v529_v22 }
 0x96e   :  { %533 = vrot.lane.b32.xlu1 %v531_v23, %s1336_s10 }
 0x9e0   :  { %v534_v26 = vpop.permute.xlu1 %533 }
 0x9e1   :  { %v536_v27 = vadd.f32 %v534_v26, %v526_v25 }
 0x9e3   :  { %1278 = vtanh.f32 %v536_v27  ;;  %v628_v42 = vrot.slane %v536_v27, 6 }
 0x9f0   :  { %v1279_v12 = vpop.eup %1278 }
 0x9f1   :  { %539 = vrot.lane.b32.xlu0 %v1279_v12, %s1336_s10 }
 0xa63   :  { %v540_v28 = vpop.permute.xlu0 %539 }
 0xa64   :  { %v542_v29 = vmul.f32 %v1277_v21, %v540_v28 }
 0xa66   :  { %v544_v30 = vrot.slane %v542_v29, 6 }
 0xa68   :  { %545 = vrot.lane.b32.xlu1 %v544_v30, %s1337_s3 }
 0xada   :  { %v546_v31 = vpop.permute.xlu1 %545 }
 0xadb   :  { %1197 = vmatmul.mubr.msk.f32.vlgmr.msra.gmra.mxu1 %vm124_vm3, %v546_v31 }
 0xadc   :  { %1211 = vmatpush3.msra.mxu1 %v1384_v3  ;;  %1218 = vmatprep.mubr.msk.f32.mxu1 %vm1335_vm2, %v1334_v2 }
 0xadd   :  { %1212 = vmatprep.subr.mxu1 %v1334_v2 }
 0xade   :  { %1213 = vmatpush3.msra.mxu1 %v1392_v5 }
 0xadf   :  { %1214 = vmatprep.subr.mxu1 %v1334_v2 }
 0xae0   :  { %1215 = vmatpush3.msra.mxu1 %v1399_v6 }
 0xae1   :  { %1216 = vmatprep.subr.mxu1 %v1334_v2 }
 0xae2   :  { %1217 = vmatpush3.msra.mxu1 %v1409_v7 }
 0xae3   :  { %1232 = vmatprep.subr.mxu1 %v1334_v2 }
 0xb9b   :  { %v615_v32 = vpop.f32.mrf.mxu1 }
 0xb9c   :  { %v619_v33 = vadd.f32 %v615_v32, %v1439_v10 }
 0xb9d   :  { %v1198_v34 = vpop.f32.mrf.mxu1 }
 0xb9e   :  { %1280 = vtanh.f32 %v619_v33  ;;  %v1082_v36 = vmul.f32 -1.442695, %v619_v33 }
 0xba0   :  { %1282 = vpow2.f32 %v1082_v36 }
 0xbab   :  { %v1281_v35 = vpop.eup %1280 }
 0xbac   :  { %632 = vrot.lane.b32.xlu0 %v1281_v35, %s1336_s10 }
 0xbad   :  { %v1283_v37 = vpop.eup %1282 }
 0xbae   :  { %v623_v38 = vadd.f32 1.0, %v1283_v37 }
 0xbb0   :  { %1284 = vrcp.f32 %v623_v38 }
 0xbbd   :  { %v1285_v39 = vpop.eup %1284 }
 0xbbe   :  { %v630_v43 = vmul.f32 %v1285_v39, %v628_v42 }
 0xc1e   :  { %v633_v40 = vpop.permute.xlu0 %632 }
 0xc1f   :  { %v635_v41 = vmul.f32 %v1285_v39, %v633_v40 }
 0xc21   :  { %637 = vrot.lane.b32.xlu1 %v635_v41, %s1336_s10 }
 0xc93   :  { %v638_v44 = vpop.permute.xlu1 %637 }
 0xc94   :  { %v640_v45 = vadd.f32 %v638_v44, %v630_v43  ;;  %v969_v43 = vld [vmem:[%s1567_s4 + $0x10] sm:$0xff]  ;;  %v968_v44 = vld [vmem:[%s1567_s4 + $0x8] sm:$0xff] }
 0xc96   :  { %1286 = vtanh.f32 %v640_v45 }
 0xca3   :  { %v1287_v46 = vpop.eup %1286 }
 0xca4   :  { %643 = vrot.lane.b32.xlu0 %v1287_v46, %s1336_s10 }
 0xd16   :  { %v644_v47 = vpop.permute.xlu0 %643 }
 0xd17   :  { %v646_v48 = vmul.f32 %v1285_v39, %v644_v47 }
 0xd19   :  { %648 = vrot.lane.b32.xlu1 %v646_v48, %s1337_s3 }
 0xd8b   :  { %v649_v49 = vpop.permute.xlu1 %648 }
 0xd8c   :  { %1208 = vmatmul.mubr.msk.f32.vlgmr.msra.gmra.mxu0 %vm124_vm3, %v649_v49 }
 0xd8d   :  { %1222 = vmatpush3.msra.mxu0 %v1384_v3  ;;  %1229 = vmatprep.mubr.msk.f32.mxu0 %vm1335_vm2, %v1334_v2 }
 0xd8e   :  { %1223 = vmatprep.subr.mxu0 %v1334_v2 }
 0xd8f   :  { %1224 = vmatpush3.msra.mxu0 %v1392_v5 }
 0xd90   :  { %1225 = vmatprep.subr.mxu0 %v1334_v2 }
 0xd91   :  { %1226 = vmatpush3.msra.mxu0 %v1399_v6 }
 0xd92   :  { %1227 = vmatprep.subr.mxu0 %v1334_v2 }
 0xd93   :  { %1228 = vmatpush3.msra.mxu0 %v1409_v7  ;;  %v734_v7 = vrot.slane %v640_v45, 6  ;;  %v967_v45 = vld [vmem:[%s1567_s4] sm:$0xff] }
 0xe4c   :  { %v718_v50 = vpop.f32.mrf.mxu0 }
 0xe4d   :  { %v723_v51 = vrot.slane %v718_v50, 6 }
 0xe4e   :  { %v1209_v52 = vpop.f32.mrf.mxu0 }
 0xe4f   :  { %v725_v3 = vadd.f32 %v723_v51, %v1439_v10  ;;  %v1089_v51 = vld [vmem:[%s1568_s5] ss:$0 sm:$0xff] }
 0xe51   :  { %1288 = vtanh.f32 %v725_v3  ;;  %v1084_v54 = vmul.f32 -1.442695, %v725_v3 }
 0xe53   :  { %1290 = vpow2.f32 %v1084_v54 }
 0xe5e   :  { %v1289_v53 = vpop.eup %1288 }
 0xe5f   :  { %738 = vrot.lane.b32.xlu0 %v1289_v53, %s1336_s10 }
 0xe60   :  { %v1291_v5 = vpop.eup %1290 }
 0xe61   :  { %v729_v55 = vadd.f32 1.0, %v1291_v5 }
 0xe63   :  { %1292 = vrcp.f32 %v729_v55 }
 0xe70   :  { %v1293_v56 = vpop.eup %1292 }
 0xe71   :  { %v736_v58 = vmul.f32 %v1293_v56, %v734_v7 }
 0xed1   :  { %v739_v6 = vpop.permute.xlu0 %738 }
 0xed2   :  { %v741_v57 = vmul.f32 %v1293_v56, %v739_v6 }
 0xed4   :  { %743 = vrot.lane.b32.xlu1 %v741_v57, %s1336_s10 }
 0xf46   :  { %v744_v59 = vpop.permute.xlu1 %743 }
 0xf47   :  { %v746_v60 = vadd.f32 %v744_v59, %v736_v58 }
 0xf49   :  { %1294 = vtanh.f32 %v746_v60  ;;  %v841_v20 = vrot.slane %v746_v60, 6 }
 0xf56   :  { %v1295_v61 = vpop.eup %1294 }
 0xf57   :  { %749 = vrot.lane.b32.xlu0 %v1295_v61, %s1336_s10 }
 0xfc9   :  { %v750_v62 = vpop.permute.xlu0 %749 }
 0xfca   :  { %v752_v63 = vmul.f32 %v1293_v56, %v750_v62 }
 0xfcc   :  { %v754_v0 = vrot.slane %v752_v63, 2 }
 0xfce   :  { %755 = vrot.lane.b32.xlu1 %v754_v0, %s1337_s3 }
0x1040   :  { %v756_v1 = vpop.permute.xlu1 %755 }
0x1041   :  { %1219 = vmatmul.mubr.msk.f32.vlgmr.msra.gmra.mxu1 %vm124_vm3, %v756_v1 }
0x1042   :  { %1240 = vmatprep.mubr.msk.f32.mxu1 %vm1335_vm2, %v1334_v2 }
0x1101   :  { %v825_v4 = vpop.f32.mrf.mxu1 }
0x1102   :  { %v830_v8 = vrot.slane %v825_v4, 4 }
0x1103   :  { %v1220_v9 = vpop.f32.mrf.mxu1 }
0x1104   :  { %v832_v11 = vadd.f32 %v830_v8, %v1439_v10 }
0x1106   :  { %1296 = vtanh.f32 %v832_v11  ;;  %v1086_v14 = vmul.f32 -1.442695, %v832_v11 }
0x1108   :  { %1298 = vpow2.f32 %v1086_v14 }
0x1113   :  { %v1297_v13 = vpop.eup %1296 }
0x1114   :  { %845 = vrot.lane.b32.xlu0 %v1297_v13, %s1336_s10 }
0x1115   :  { %v1299_v15 = vpop.eup %1298 }
0x1116   :  { %v836_v16 = vadd.f32 1.0, %v1299_v15 }
0x1118   :  { %1300 = vrcp.f32 %v836_v16 }
0x1125   :  { %v1301_v17 = vpop.eup %1300 }
0x1126   :  { %v843_v21 = vmul.f32 %v1301_v17, %v841_v20 }
0x1186   :  { %v846_v18 = vpop.permute.xlu0 %845 }
0x1187   :  { %v848_v19 = vmul.f32 %v1301_v17, %v846_v18 }
0x1189   :  { %850 = vrot.lane.b32.xlu1 %v848_v19, %s1336_s10 }
0x11fb   :  { %v851_v22 = vpop.permute.xlu1 %850 }
0x11fc   :  { %v853_v23 = vadd.f32 %v851_v22, %v843_v21 }
0x11fe   :  { %1302 = vtanh.f32 %v853_v23  ;;  %v948_v39 = vrot.slane %v853_v23, 6 }
0x120b   :  { %v1303_v24 = vpop.eup %1302 }
0x120c   :  { %856 = vrot.lane.b32.xlu0 %v1303_v24, %s1336_s10 }
0x127e   :  { %v857_v25 = vpop.permute.xlu0 %856 }
0x127f   :  { %v859_v26 = vmul.f32 %v1301_v17, %v857_v25 }
0x1281   :  { %v861_v27 = vrot.slane %v859_v26, 4 }
0x1283   :  { %862 = vrot.lane.b32.xlu1 %v861_v27, %s1337_s3 }
0x12f5   :  { %v863_v12 = vpop.permute.xlu1 %862 }
0x12f6   :  { %1230 = vmatmul.mubr.msk.f32.vlgmr.msra.gmra.mxu0 %vm124_vm3, %v863_v12 }
0x13b6   :  { %v932_v28 = vpop.f32.mrf.mxu0 }
0x13b7   :  { %v937_v29 = vrot.slane %v932_v28, 2 }
0x13b8   :  { %v1231_v30 = vpop.f32.mrf.mxu0 }
0x13b9   :  { %v939_v31 = vadd.f32 %v937_v29, %v1439_v10  ;;  %v970_v10 = vld [vmem:[%s1567_s4 + $0x18] sm:$0xff]  ;;  %s1338_s4 = smov [#allocation2]  }
0x13ba   :  { %1233 = vmatpush3.msra.mxu1 %v970_v10  ;;  %s1062_s21 = sshll.u32 %s1338_s4, 4  ;;  %s1063_s21 = int_to_ptr.vmem [resolvable:$true] %s1062_s21 }
0x13bb   :  { %1304 = vtanh.f32 %v939_v31  ;;  %v1088_v33 = vmul.f32 -1.442695, %v939_v31  ;;  %1234 = vmatprep.subr.mxu1 %v1334_v2  ;;  %s1312_s22 = scalar_lea.vmem %s1063_s21, 32  ;;  %p1317_p1 = scmp.lt.s32.totalorder %s1063_s21, %s1063_s21 }
0x13bc   :  { %1235 = vmatpush3.msra.mxu1 %v969_v43  ;;  %p1313_p0 = scmp.ne.s32.totalorder %s1063_s21, %s1312_s22  ;;  %p1318_p2 = scmp.lt.s32.totalorder %s1312_s22, %s1312_s22 }
0x13bd   :  { %1306 = vpow2.f32 %v1088_v33  ;;  %1236 = vmatprep.subr.mxu1 %v1334_v2 }
0x13be   :  { %1237 = vmatpush3.msra.mxu1 %v968_v44  ;;  %p1319_p3 = por %p1318_p2, %p1317_p1 }
0x13bf   :  { %1238 = vmatprep.subr.mxu1 %v1334_v2 }
0x13c0   :  { %1239 = vmatpush3.msra.mxu1 %v967_v45  ;;  %p1320_p4 = pnand %p1319_p3, %p1313_p0 }
0x13c8   :  { %v1305_v32 = vpop.eup %1304 }
0x13c9   :  { %952 = vrot.lane.b32.xlu0 %v1305_v32, %s1336_s10 }
0x13ca   :  { %v1307_v34 = vpop.eup %1306 }
0x13cb   :  { %v943_v35 = vadd.f32 1.0, %v1307_v34 }
0x13cd   :  { %1308 = vrcp.f32 %v943_v35 }
0x13da   :  { %v1309_v36 = vpop.eup %1308 }
0x13db   :  { %v950_v40 = vmul.f32 %v1309_v36, %v948_v39 }
0x143b   :  { %v953_v37 = vpop.permute.xlu0 %952 }
0x143c   :  { %v955_v38 = vmul.f32 %v1309_v36, %v953_v37 }
0x143e   :  { %957 = vrot.lane.b32.xlu1 %v955_v38, %s1336_s10 }
0x14b0   :  { %v958_v41 = vpop.permute.xlu1 %957 }
0x14b1   :  { %v960_v42 = vadd.f32 %v958_v41, %v950_v40 }
0x14b3   :  { %1310 = vtanh.f32 %v960_v42 }
0x14c0   :  { %v1311_v46 = vpop.eup %1310 }
0x14c1   :  { %963 = vrot.lane.b32.xlu0 %v1311_v46, %s1336_s10 }
0x1533   :  { %v964_v47 = vpop.permute.xlu0 %963 }
0x1534   :  { %v966_v48 = vmul.f32 %v1309_v36, %v964_v47 }
0x1536   :  { %v979_v49 = vrot.slane %v966_v48, 6 }
0x1538   :  { %980 = vrot.lane.b32.xlu1 %v979_v49, %s1337_s3 }
0x15aa   :  { %v981_v50 = vpop.permute.xlu1 %980 }
0x15ab   :  { %1241 = vmatmul.mubr.msk.f32.vlgmr.msra.gmra.mxu1 %vm124_vm3, %v981_v50 }
0x166b   :  { %v1050_v52 = vpop.f32.mrf.mxu1 }
0x166c   :  { %v1051_v2 = vadd.f32 %v1089_v51, %v1050_v52 }
0x166d   :  { %v1242_v3 = vpop.f32.mrf.mxu1 }
0x166e   :  { %1055 = vst.msk [vmem:[#allocation2] sm:$0x3] %vm1054_vm4, %v1051_v2 }
0x166f   :  { %1323 = shalt.err (!%p1320_p4)
}
0x1670   :  { %1065 = dma.vmem_to_hbm [thread:$0]  %s1063_s21, 32, %s1569_s6, [#allocation3]  }
0x1671   :  { %1332 = dma.done.wait [#allocation3], 32  }
0x1672   :  { %1333 = vsyncadd [#allocation3], 4294967264 }
0x1673   :  { %1069 = vsyncpa [#allocation3], 1 }

</bundles_post_ra>
